<compile_context>
chip_gen: v7x
topology: tpu7x:2x2x1
jax: 0.10.0
libtpu: 0.0.40
codegen_flags: <defaults>
</compile_context>

<pallas_src>
import math

import jax
import jax.numpy as jnp
from jax.experimental import pallas as pl
from jax.experimental.pallas import tpu as pltpu

# ---- configuration (matches module __init__ shapes at small test size) ----
H = 16
W = 16
CH = 3                                   # output channels (module default ch=3)
NUM_FREQ = 4                             # PosEncodingNeRF frequencies for 2-D input
IN_FEATURES = 2 + 2 * 2 * NUM_FREQ       # = 18  (mlp_cfg.in_features == PE out_dim)
HIDDEN = 32                              # mlp_cfg.hidden_features
K_PE = 2 * NUM_FREQ                      # 8 sin args / 8 cos args per pixel


def _make_kernel(h_img, w_img, tile):
    """Kernel works on a (features, tile) transposed layout; `tile` pixels per grid step."""
    sx = 2.0 / (h_img - 1) if h_img > 1 else 0.0
    sy = 2.0 / (w_img - 1) if w_img > 1 else 0.0

    def kernel(w1c_ref, w1s_ref, w1k_ref, b1_ref, w2_ref, b2_ref, w3_ref, b3_ref, out_ref):
        # ---- in-kernel coordinate generation (exact for H*W < ~8M pixels in f32) ----
        base = pl.program_id(0) * tile
        n_i = jax.lax.broadcasted_iota(jnp.int32, (1, tile), 1) + base      # flat pixel index
        n_f = n_i.astype(jnp.float32)
        i_f = jnp.floor(n_f / float(w_img))                                 # image row
        j_f = n_f - i_f * float(w_img)                                      # image col
        x = i_f * sx - 1.0                                                  # (1, tile)
        y = j_f * sy - 1.0                                                  # (1, tile)

        # ---- vectorized NeRF positional encoding ----
        # Row k of `args` (k = 2*i + j) is (2^i * pi) * coord_j, matching the PE feature order.
        row = jax.lax.broadcasted_iota(jnp.int32, (K_PE, tile), 0).astype(jnp.float32)
        half = jnp.floor(row * 0.5)                                         # frequency index i
        is_y = (row - 2.0 * half) > 0.5                                     # odd rows -> y coord
        cval = jnp.where(is_y, y, x)                                        # (K_PE, tile)
        scale = jnp.full_like(row, math.pi)
        for f in range(1, NUM_FREQ):                                        # exact pi * 2^i
            scale = jnp.where(half >= float(f), math.pi * (2.0 ** f), scale)
        args = scale * cval
        sin_a = jnp.sin(args)                                               # one EUP-batched sin
        cos_a = jnp.cos(args)                                               # one EUP-batched cos
        c2 = cval[0:2, :]                                                   # rows 0,1 == (x, y)

        # ---- FCBlock MLP (transposed): first layer is 3 accumulated dots, no concat ----
        h = jnp.dot(w1c_ref[...], c2, preferred_element_type=jnp.float32)
        h = h + jnp.dot(w1s_ref[...], sin_a, preferred_element_type=jnp.float32)
        h = h + jnp.dot(w1k_ref[...], cos_a, preferred_element_type=jnp.float32)
        h = jnp.maximum(h + b1_ref[...], 0.0)
        h = jnp.maximum(jnp.dot(w2_ref[...], h, preferred_element_type=jnp.float32)
                        + b2_ref[...], 0.0)
        out_ref[...] = jnp.dot(w3_ref[...], h, preferred_element_type=jnp.float32) + b3_ref[...]

    return kernel


def prepare_kernel_params(params):
    """Split/transpose the canonical (in,out) MLP weights for the transposed, concat-free kernel."""
    w1, b1, w2, b2, w3, b3 = params
    sin_rows = jnp.asarray([2 + 4 * i + 2 * j for i in range(NUM_FREQ) for j in range(2)],
                           dtype=jnp.int32)
    cos_rows = sin_rows + 1
    w1c = w1[0:2, :].T                    # (HIDDEN, 2)   coord rows
    w1s = w1[sin_rows, :].T               # (HIDDEN, 8)   sin rows, order (freq0 x, freq0 y, ...)
    w1k = w1[cos_rows, :].T               # (HIDDEN, 8)   cos rows
    return (w1c, w1s, w1k, b1.reshape(-1, 1),
            w2.T, b2.reshape(-1, 1), w3.T, b3.reshape(-1, 1))


def _pick_tile(n, max_tile=2048):
    """Big lane-dense row tiles; keep >=2 grid steps when possible (v7x has 2 TensorCores)."""
    if n <= 128:
        return 128
    half = ((pl.cdiv(n, 2) + 127) // 128) * 128
    return int(min(max_tile, half))


def image_phasor_forward(params, h_img=H, w_img=W, tile_rows=None):
    """Returns the module forward output: (H, W*CH) float32."""
    n = h_img * w_img
    if tile_rows is None:
        tile_rows = _pick_tile(n)
    n_pad = pl.cdiv(n, tile_rows) * tile_rows          # coords generated in-kernel -> pad is free
    grid = (n_pad // tile_rows,)

    kparams = prepare_kernel_params(params)
    kernel = _make_kernel(h_img, w_img, tile_rows)

    full = lambda arr: pl.BlockSpec(arr.shape, lambda i: (0, 0))   # grid-invariant weights/biases

    out_t = pl.pallas_call(
        kernel,
        out_shape=jax.ShapeDtypeStruct((CH, n_pad), jnp.float32),
        grid_spec=pltpu.PrefetchScalarGridSpec(
            num_scalar_prefetch=0,
            grid=grid,
            in_specs=[full(p) for p in kparams],
            out_specs=pl.BlockSpec((CH, tile_rows), lambda i: (0, i)),   # lane-dense output
        ),
        compiler_params=pltpu.CompilerParams(dimension_semantics=("parallel",)),
    )(*kparams)

    out = out_t[:, :n].T                                # (N, CH), row-major pixel order
    return out.reshape(h_img, w_img * CH)


def _reference_forward(coord_flat, params):
    """Pure-JAX reference of the original module math (PE layout + MLP), for validation."""
    w1, b1, w2, b2, w3, b3 = params
    feats = [coord_flat]
    for i in range(NUM_FREQ):
        scale = (2.0 ** i) * math.pi
        for j in range(2):
            cj = coord_flat[:, j:j + 1]
            feats.append(jnp.sin(scale * cj))
            feats.append(jnp.cos(scale * cj))
    feat = jnp.concatenate(feats, axis=-1)
    h = jnp.maximum(feat @ w1 + b1, 0.0)
    h = jnp.maximum(h @ w2 + b2, 0.0)
    return h @ w3 + b3


def make_params(key):
    """Deterministic synthetic MLP parameters. Weights stored (in, out); forward is x @ W + b."""
    ks = jax.random.split(key, 6)

    def lin(kw, kb, fan_in, fan_out):
        bound = 1.0 / math.sqrt(fan_in)
        w = jax.random.uniform(kw, (fan_in, fan_out), jnp.float32, -bound, bound)
        b = jax.random.uniform(kb, (1, fan_out), jnp.float32, -bound, bound)
        return w, b

    w1, b1 = lin(ks[0], ks[1], IN_FEATURES, HIDDEN)
    w2, b2 = lin(ks[2], ks[3], HIDDEN, HIDDEN)
    w3, b3 = lin(ks[4], ks[5], HIDDEN, CH)
    return (w1, b1, w2, b2, w3, b3)


if __name__ == "__main__":
    key = jax.random.PRNGKey(0)
    params = make_params(key)

    out = image_phasor_forward(params)                  # (H, W*CH)
    out = jax.block_until_ready(out)

    # Reference path: module-style meshgrid('ij') of linspace(-1,1,·), NeRF PE, 3-layer MLP.
    norm_xx = jnp.linspace(-1.0, 1.0, H, dtype=jnp.float32)
    norm_yy = jnp.linspace(-1.0, 1.0, W, dtype=jnp.float32)
    gx, gy = jnp.meshgrid(norm_xx, norm_yy, indexing="ij")
    coord_flat = jnp.stack([gx, gy], axis=-1).reshape(-1, 2)     # (H*W, 2)
    ref = _reference_forward(coord_flat, params).reshape(H, -1)  # (H, W*CH)

    assert out.shape == (H, W * CH)
    max_err = float(jnp.max(jnp.abs(out - ref)))
    # Tolerance covers f32 ulp differences from the restructured (split/transposed) matmuls and
    # the analytic linspace generated in-kernel vs jnp.linspace.
    assert max_err < 1e-4, f"Pallas output mismatch vs JAX reference (max abs err {max_err})"

    print("KERNEL_OK")
</pallas_src>

<mosaic_0001>
module attributes {stable_mosaic.version = 11 : i64} {
  func.func @kernel(%arg0: i32, %arg1: memref<32x2xf32, #tpu.memory_space<vmem>>, %arg2: memref<32x8xf32, #tpu.memory_space<vmem>>, %arg3: memref<32x8xf32, #tpu.memory_space<vmem>>, %arg4: memref<32x1xf32, #tpu.memory_space<vmem>>, %arg5: memref<32x32xf32, #tpu.memory_space<vmem>>, %arg6: memref<32x1xf32, #tpu.memory_space<vmem>>, %arg7: memref<3x32xf32, #tpu.memory_space<vmem>>, %arg8: memref<3x1xf32, #tpu.memory_space<vmem>>, %arg9: memref<3x128xf32, #tpu.memory_space<vmem>>) attributes {dimension_semantics = [#tpu.dimension_semantics<parallel>], iteration_bounds = array<i64: 2>, scalar_prefetch = 0 : i64, scratch_operands = 0 : i64, tpu.core_type = #tpu.core_type<tc>, window_params = [{pipeline_mode = #tpu.pipeline_mode<synchronous>, transform_indices = @transform_0, window_bounds = array<i64: 32, 2>}, {pipeline_mode = #tpu.pipeline_mode<synchronous>, transform_indices = @transform_1, window_bounds = array<i64: 32, 8>}, {pipeline_mode = #tpu.pipeline_mode<synchronous>, transform_indices = @transform_2, window_bounds = array<i64: 32, 8>}, {pipeline_mode = #tpu.pipeline_mode<synchronous>, transform_indices = @transform_3, window_bounds = array<i64: 32, 1>}, {pipeline_mode = #tpu.pipeline_mode<synchronous>, transform_indices = @transform_4, window_bounds = array<i64: 32, 32>}, {pipeline_mode = #tpu.pipeline_mode<synchronous>, transform_indices = @transform_5, window_bounds = array<i64: 32, 1>}, {pipeline_mode = #tpu.pipeline_mode<synchronous>, transform_indices = @transform_6, window_bounds = array<i64: 3, 32>}, {pipeline_mode = #tpu.pipeline_mode<synchronous>, transform_indices = @transform_7, window_bounds = array<i64: 3, 1>}, {transform_indices = @transform_8, window_bounds = array<i64: 3, 128>}]} {
    %c128_i32 = arith.constant 128 : i32
    %0 = arith.muli %arg0, %c128_i32 : i32
    %1 = tpu.iota {dimensions = array<i32: 1>} : vector<1x128xi32>
    %2 = vector.broadcast %0 : i32 to vector<1x128xi32>
    %3 = arith.addi %1, %2 : vector<1x128xi32>
    %4 = arith.sitofp %3 : vector<1x128xi32> to vector<1x128xf32>
    %cst = arith.constant 1.600000e+01 : f32
    %5 = vector.broadcast %cst : f32 to vector<1x128xf32>
    %6 = arith.divf %4, %5 : vector<1x128xf32>
    %7 = math.floor %6 : vector<1x128xf32>
    %cst_0 = arith.constant 1.600000e+01 : f32
    %8 = vector.broadcast %cst_0 : f32 to vector<1x128xf32>
    %9 = arith.mulf %7, %8 : vector<1x128xf32>
    %10 = arith.subf %4, %9 : vector<1x128xf32>
    %cst_1 = arith.constant 0.13333334 : f32
    %11 = vector.broadcast %cst_1 : f32 to vector<1x128xf32>
    %12 = arith.mulf %7, %11 : vector<1x128xf32>
    %cst_2 = arith.constant 1.000000e+00 : f32
    %13 = vector.broadcast %cst_2 : f32 to vector<1x128xf32>
    %14 = arith.subf %12, %13 : vector<1x128xf32>
    %cst_3 = arith.constant 0.13333334 : f32
    %15 = vector.broadcast %cst_3 : f32 to vector<1x128xf32>
    %16 = arith.mulf %10, %15 : vector<1x128xf32>
    %cst_4 = arith.constant 1.000000e+00 : f32
    %17 = vector.broadcast %cst_4 : f32 to vector<1x128xf32>
    %18 = arith.subf %16, %17 : vector<1x128xf32>
    %19 = tpu.iota {dimensions = array<i32: 0>} : vector<8x128xi32>
    %20 = arith.sitofp %19 : vector<8x128xi32> to vector<8x128xf32>
    %cst_5 = arith.constant 5.000000e-01 : f32
    %21 = vector.broadcast %cst_5 : f32 to vector<8x128xf32>
    %22 = arith.mulf %20, %21 : vector<8x128xf32>
    %23 = math.floor %22 : vector<8x128xf32>
    %cst_6 = arith.constant 2.000000e+00 : f32
    %24 = vector.broadcast %cst_6 : f32 to vector<8x128xf32>
    %25 = arith.mulf %24, %23 : vector<8x128xf32>
    %26 = arith.subf %20, %25 : vector<8x128xf32>
    %cst_7 = arith.constant 5.000000e-01 : f32
    %27 = vector.broadcast %cst_7 : f32 to vector<8x128xf32>
    %28 = arith.cmpf ogt, %26, %27 : vector<8x128xf32>
    %29 = vector.shape_cast %18 : vector<1x128xf32> to vector<1x128xf32>
    %30 = vector.broadcast %29 : vector<1x128xf32> to vector<8x128xf32>
    %31 = vector.shape_cast %14 : vector<1x128xf32> to vector<1x128xf32>
    %32 = vector.broadcast %31 : vector<1x128xf32> to vector<8x128xf32>
    %33 = arith.select %28, %30, %32 : vector<8x128xi1>, vector<8x128xf32>
    %cst_8 = arith.constant 3.14159274 : f32
    %34 = vector.broadcast %cst_8 : f32 to vector<8x128xf32>
    %cst_9 = arith.constant 1.000000e+00 : f32
    %35 = vector.broadcast %cst_9 : f32 to vector<8x128xf32>
    %36 = arith.cmpf oge, %23, %35 : vector<8x128xf32>
    %cst_10 = arith.constant 6.28318548 : f32
    %37 = vector.broadcast %cst_10 : f32 to vector<8x128xf32>
    %38 = arith.select %36, %37, %34 : vector<8x128xi1>, vector<8x128xf32>
    %cst_11 = arith.constant 2.000000e+00 : f32
    %39 = vector.broadcast %cst_11 : f32 to vector<8x128xf32>
    %40 = arith.cmpf oge, %23, %39 : vector<8x128xf32>
    %cst_12 = arith.constant 12.566371 : f32
    %41 = vector.broadcast %cst_12 : f32 to vector<8x128xf32>
    %42 = arith.select %40, %41, %38 : vector<8x128xi1>, vector<8x128xf32>
    %cst_13 = arith.constant 3.000000e+00 : f32
    %43 = vector.broadcast %cst_13 : f32 to vector<8x128xf32>
    %44 = arith.cmpf oge, %23, %43 : vector<8x128xf32>
    %cst_14 = arith.constant 25.1327419 : f32
    %45 = vector.broadcast %cst_14 : f32 to vector<8x128xf32>
    %46 = arith.select %44, %45, %42 : vector<8x128xi1>, vector<8x128xf32>
    %47 = arith.mulf %46, %33 : vector<8x128xf32>
    %48 = math.sin %47 : vector<8x128xf32>
    %49 = math.cos %47 : vector<8x128xf32>
    %50 = vector.extract_strided_slice %33 {offsets = [0, 0], sizes = [2, 128], strides = [1, 1]} : vector<8x128xf32> to vector<2x128xf32>
    %c0 = arith.constant 0 : index
    %c0_15 = arith.constant 0 : index
    %51 = vector.load %arg1[%c0, %c0_15] : memref<32x2xf32, #tpu.memory_space<vmem>>, vector<32x2xf32>
    %cst_16 = arith.constant dense<0.000000e+00> : vector<32x128xf32>
    %52 = tpu.matmul %51, %50, %cst_16 {dimension_numbers = #tpu.dot_dimension_numbers<[1], [0], [0], [1], [0, 0, 1, 1], [], []>} : vector<32x2xf32>, vector<2x128xf32>, vector<32x128xf32> -> vector<32x128xf32>
    %c0_17 = arith.constant 0 : index
    %c0_18 = arith.constant 0 : index
    %53 = vector.load %arg2[%c0_17, %c0_18] : memref<32x8xf32, #tpu.memory_space<vmem>>, vector<32x8xf32>
    %cst_19 = arith.constant dense<0.000000e+00> : vector<32x128xf32>
    %54 = tpu.matmul %53, %48, %cst_19 {dimension_numbers = #tpu.dot_dimension_numbers<[1], [0], [0], [1], [0, 0, 1, 1], [], []>} : vector<32x8xf32>, vector<8x128xf32>, vector<32x128xf32> -> vector<32x128xf32>
    %55 = arith.addf %52, %54 : vector<32x128xf32>
    %c0_20 = arith.constant 0 : index
    %c0_21 = arith.constant 0 : index
    %56 = vector.load %arg3[%c0_20, %c0_21] : memref<32x8xf32, #tpu.memory_space<vmem>>, vector<32x8xf32>
    %cst_22 = arith.constant dense<0.000000e+00> : vector<32x128xf32>
    %57 = tpu.matmul %56, %49, %cst_22 {dimension_numbers = #tpu.dot_dimension_numbers<[1], [0], [0], [1], [0, 0, 1, 1], [], []>} : vector<32x8xf32>, vector<8x128xf32>, vector<32x128xf32> -> vector<32x128xf32>
    %58 = arith.addf %55, %57 : vector<32x128xf32>
    %c0_23 = arith.constant 0 : index
    %c0_24 = arith.constant 0 : index
    %59 = vector.load %arg4[%c0_23, %c0_24] : memref<32x1xf32, #tpu.memory_space<vmem>>, vector<32x1xf32>
    %60 = vector.broadcast %59 : vector<32x1xf32> to vector<32x128xf32>
    %61 = arith.addf %58, %60 : vector<32x128xf32>
    %cst_25 = arith.constant 0.000000e+00 : f32
    %62 = vector.broadcast %cst_25 : f32 to vector<32x128xf32>
    %63 = arith.maximumf %61, %62 : vector<32x128xf32>
    %c0_26 = arith.constant 0 : index
    %c0_27 = arith.constant 0 : index
    %64 = vector.load %arg5[%c0_26, %c0_27] : memref<32x32xf32, #tpu.memory_space<vmem>>, vector<32x32xf32>
    %cst_28 = arith.constant dense<0.000000e+00> : vector<32x128xf32>
    %65 = tpu.matmul %64, %63, %cst_28 {dimension_numbers = #tpu.dot_dimension_numbers<[1], [0], [0], [1], [0, 0, 1, 1], [], []>} : vector<32x32xf32>, vector<32x128xf32>, vector<32x128xf32> -> vector<32x128xf32>
    %c0_29 = arith.constant 0 : index
    %c0_30 = arith.constant 0 : index
    %66 = vector.load %arg6[%c0_29, %c0_30] : memref<32x1xf32, #tpu.memory_space<vmem>>, vector<32x1xf32>
    %67 = vector.broadcast %66 : vector<32x1xf32> to vector<32x128xf32>
    %68 = arith.addf %65, %67 : vector<32x128xf32>
    %cst_31 = arith.constant 0.000000e+00 : f32
    %69 = vector.broadcast %cst_31 : f32 to vector<32x128xf32>
    %70 = arith.maximumf %68, %69 : vector<32x128xf32>
    %c0_32 = arith.constant 0 : index
    %c0_33 = arith.constant 0 : index
    %71 = vector.load %arg7[%c0_32, %c0_33] : memref<3x32xf32, #tpu.memory_space<vmem>>, vector<3x32xf32>
    %cst_34 = arith.constant dense<0.000000e+00> : vector<3x128xf32>
    %72 = tpu.matmul %71, %70, %cst_34 {dimension_numbers = #tpu.dot_dimension_numbers<[1], [0], [0], [1], [0, 0, 1, 1], [], []>} : vector<3x32xf32>, vector<32x128xf32>, vector<3x128xf32> -> vector<3x128xf32>
    %c0_35 = arith.constant 0 : index
    %c0_36 = arith.constant 0 : index
    %73 = vector.load %arg8[%c0_35, %c0_36] : memref<3x1xf32, #tpu.memory_space<vmem>>, vector<3x1xf32>
    %74 = vector.broadcast %73 : vector<3x1xf32> to vector<3x128xf32>
    %75 = arith.addf %72, %74 : vector<3x128xf32>
    %c0_37 = arith.constant 0 : index
    %c0_38 = arith.constant 0 : index
    %76 = vector.load %arg9[%c0_37, %c0_38] : memref<3x128xf32, #tpu.memory_space<vmem>>, vector<3x128xf32>
    tpu.vector_store %arg9[%c0_37, %c0_38], %75 {strides = array<i32>} : memref<3x128xf32, #tpu.memory_space<vmem>>, vector<3x128xf32>,
    return
  }
  func.func @transform_0(%arg0: i32) -> (i32, i32) {
    %c0_i32 = arith.constant 0 : i32
    %c0_i32_0 = arith.constant 0 : i32
    %c0_i32_1 = arith.constant 0 : i32
    return %c0_i32, %c0_i32_0 : i32, i32
  }
  func.func @transform_1(%arg0: i32) -> (i32, i32) {
    %c0_i32 = arith.constant 0 : i32
    %c0_i32_0 = arith.constant 0 : i32
    %c0_i32_1 = arith.constant 0 : i32
    return %c0_i32, %c0_i32_0 : i32, i32
  }
  func.func @transform_2(%arg0: i32) -> (i32, i32) {
    %c0_i32 = arith.constant 0 : i32
    %c0_i32_0 = arith.constant 0 : i32
    %c0_i32_1 = arith.constant 0 : i32
    return %c0_i32, %c0_i32_0 : i32, i32
  }
  func.func @transform_3(%arg0: i32) -> (i32, i32) {
    %c0_i32 = arith.constant 0 : i32
    %c0_i32_0 = arith.constant 0 : i32
    %c0_i32_1 = arith.constant 0 : i32
    return %c0_i32, %c0_i32_0 : i32, i32
  }
  func.func @transform_4(%arg0: i32) -> (i32, i32) {
    %c0_i32 = arith.constant 0 : i32
    %c0_i32_0 = arith.constant 0 : i32
    %c0_i32_1 = arith.constant 0 : i32
    return %c0_i32, %c0_i32_0 : i32, i32
  }
  func.func @transform_5(%arg0: i32) -> (i32, i32) {
    %c0_i32 = arith.constant 0 : i32
    %c0_i32_0 = arith.constant 0 : i32
    %c0_i32_1 = arith.constant 0 : i32
    return %c0_i32, %c0_i32_0 : i32, i32
  }
  func.func @transform_6(%arg0: i32) -> (i32, i32) {
    %c0_i32 = arith.constant 0 : i32
    %c0_i32_0 = arith.constant 0 : i32
    %c0_i32_1 = arith.constant 0 : i32
    return %c0_i32, %c0_i32_0 : i32, i32
  }
  func.func @transform_7(%arg0: i32) -> (i32, i32) {
    %c0_i32 = arith.constant 0 : i32
    %c0_i32_0 = arith.constant 0 : i32
    %c0_i32_1 = arith.constant 0 : i32
    return %c0_i32, %c0_i32_0 : i32, i32
  }
  func.func @transform_8(%arg0: i32) -> (i32, i32) {
    %c0_i32 = arith.constant 0 : i32
    %c0_i32_0 = arith.constant 0 : i32
    return %c0_i32, %arg0 : i32, i32
  }
}

</mosaic_0001>

<bundles_post_ra>
// kernel: tpu_custom_call.1
= control target key start
LH: loop header
LB: loop body
LE: loop exit
PB: predicated region body
PF: predicated region fallthrough
CT: control target
= control target key end

     0   :  { %13 = vsyncpa [#allocation3], 0  ;;  %s1668_s0 = inlined_call_operand.vmem [shape: f32[32,2], index: 0, kind: input, shape index: {}]   ;;  %s1669_s1 = inlined_call_operand.vmem [shape: f32[32,8], index: 1, kind: input, shape index: {}]   ;;  %s1670_s2 = inlined_call_operand.vmem [shape: f32[32,8], index: 2, kind: input, shape index: {}]   ;;  %s1671_s3 = inlined_call_operand.vmem [shape: f32[32,1], index: 3, kind: input, shape index: {}]   ;;  %s1672_s4 = inlined_call_operand.vmem [shape: f32[32,32], index: 4, kind: input, shape index: {}]   ;;  %s1673_s5 = inlined_call_operand.vmem [shape: f32[32,1], index: 5, kind: input, shape index: {}]   ;;  %s1674_s6 = inlined_call_operand.vmem [shape: f32[3,32], index: 6, kind: input, shape index: {}]   ;;  %s1675_s7 = inlined_call_operand.vmem [shape: f32[3,1], index: 7, kind: input, shape index: {}]   ;;  %s1676_s8 = inlined_call_operand.hbm [shape: f32[3,256], index: 8, kind: output, shape index: {}]  }
   0x1   :  { %15 = vsyncpa [#allocation3 + $0x1], 0  ;;  %s1456_s27 = smov 0   ;;  %s1458_s28 = smov 0  }
   0x2   :  { %s1460_s29 = smov 0   ;;  %s1462_s30 = smov 0  }
   0x3 LB: > { %s1477_s9 = sadd.s32 4294967295, %s1397_s30   ;;  %s1139_s10 = sadd.s32 4294967294, %s1397_s30   ;;  %s1397_s30 = sphi %s1462_s30, %s1682_s30   ;;  %s1393_s29 = sphi %s1460_s29, %s1681_s29   ;;  %s1389_s28 = sphi %s1458_s28, %s1680_s28   ;;  %s1385_s27 = sphi %s1456_s27, %s1679_s27  }
   0x4   : > { %s1481_s11 = sadd.s32 1, %s1397_s30   ;;  %s196_s12 = sadd.s32 1, %s1393_s29 }
   0x5   : > { %s193_s13 = ssub.s32 %s1397_s30, %s1481_s11  ;;  %p206_p0 = scmp.ne.s32.totalorder %s1393_s29, %s1389_s28 }
   0x6   : > { %p194_p1 = scmp.eq.s32.totalorder %s193_s13, 0  ;;  %p207_p2 = scmp.eq.s32.totalorder %s1477_s9, 1 }
   0x7   : > { %p212_p3 = scmp.ne.s32.totalorder %s1389_s28, %s1385_s27  ;;  %p213_p4 = scmp.eq.s32.totalorder %s1139_s10, 1 }
   0x8   : > { %s1492_s14 = scalar_select %p194_p1, %s1393_s29, %s196_s12  }
   0x9   : > { %p1494_p5 = por %p207_p2, %p206_p0  ;;  %p1498_p6 = por %p213_p4, %p212_p3 }
   0xa   : > { %p1141_p7 = scmp.ge.s32.totalorder %s1397_s30, 1  ;;  %p255_p8 = scmp.lt.s32.totalorder %s1397_s30, 3 }
   0xc   : > { %p256_p9 = pnand %p1141_p7, %p255_p8 }
   0xd   : > { %s1143_s17 = sshll.u32 (!%p256_p9), %s1477_s9, 7  ;;  %v285_v0 = vlaneseq (!%p256_p9)  ;;  %v522_v1 = vld [vmem:[%s1668_s0] sm:$0xff] (!%p256_p9)  ;;  %vm628_vm0 = vcmask (!%p256_p9), 15360   ;;  %vm530_vm1 = vcmask (!%p256_p9), 64512   ;;  %v1399_v8 = vmov (!%p256_p9), 0   ;;  %v837_v12 = vld [vmem:[%s1671_s3 + $0x10] sm:$0xff] (!%p256_p9) }
   0xe   : > { %259 = sbr.rel (%p256_p9) target bundleno = 801 (0x321), region = 52  ;;  %v287_v2 = vstv (!%p256_p9), %s1143_s17  ;;  %1214 = vmatprep.mubr.msk.f32.mxu0 (!%p256_p9), %vm628_vm0, %v522_v1  ;;  %v526_v7 = vld [vmem:[%s1669_s1] sm:$0xff] (!%p256_p9)  ;;  %1329 = vset.pattern.permute.xlu0 (!%p256_p9), %v1399_v8  ;;  %v836_v15 = vld [vmem:[%s1671_s3 + $0x8] sm:$0xff] (!%p256_p9)  ;;  %v838_v16 = vld [vmem:[%s1671_s3 + $0x18] sm:$0xff] (!%p256_p9)  ;;  %v1400_v22 = vmov (!%p256_p9), 3.1415927  }
   0xf   : > { %v286_v3 = vand.u32 (!%p256_p9), 127, %v285_v0  ;;  %v300_v4 = vshrl.u32 (!%p256_p9), %v285_v0, 7  ;;  %1206 = vmatprep.mubr.msk.f32.mxu1 (!%p256_p9), %vm530_vm1, %v526_v7  ;;  %v835_v11 = vld [vmem:[%s1671_s3] sm:$0xff] (!%p256_p9)  ;;  %1330 = vset.pattern.permute.xlu1 (!%p256_p9), %v1399_v8  ;;  %v872_v25 = vld [vmem:[%s1673_s5 + $0x8] sm:$0xff] (!%p256_p9)  ;;  %v873_v30 = vld [vmem:[%s1673_s5 + $0x10] sm:$0xff] (!%p256_p9)  ;;  %vm641_vm6 = vcmask (!%p256_p9), 1041408  }
  0x10   : > { %841 = vperm.xlu0 (!%p256_p9), %1329, %v835_v11   ;;  %851 = vperm.xlu1 (!%p256_p9), %1330, %v837_v12   ;;  %v871_v19 = vld [vmem:[%s1673_s5] sm:$0xff] (!%p256_p9)  ;;  %v874_v31 = vld [vmem:[%s1673_s5 + $0x18] sm:$0xff] (!%p256_p9)  ;;  %v523_v35 = vld [vmem:[%s1668_s0 + $0x8] sm:$0xff] (!%p256_p9)  ;;  %v1401_v52 = vmov (!%p256_p9), 683565275   ;;  %s281_s18 = sand.u32 (!%p256_p9), 1, %s1389_s28  }
  0x11   : > { %v288_v5 = vadd.s32 (!%p256_p9), %v287_v2, %v286_v3  ;;  %v301_v6 = vcvt.s32.f32 (!%p256_p9), %v300_v4  ;;  %v998_v36 = vld [vmem:[%s1675_s7] sm:$0x7] (!%p256_p9)  ;;  %v524_v38 = vld [vmem:[%s1668_s0 + $0x10] sm:$0xff] (!%p256_p9)  ;;  %v525_v40 = vld [vmem:[%s1668_s0 + $0x18] sm:$0xff] (!%p256_p9)  ;;  %v1402_v54 = vmov (!%p256_p9), 2475754826  }
  0x12   : > { %v730_v42 = vld [vmem:[%s1670_s2] sm:$0xff] (!%p256_p9)  ;;  %v1403_v56 = vmov (!%p256_p9), 2131351028   ;;  %v1404_v58 = vmov (!%p256_p9), 2102212464   ;;  %s1142_s19 = sshll.u32 (!%p256_p9), %s281_s18, 2 }
  0x13   : > { %v289_v9 = vcvt.s32.f32 (!%p256_p9), %v288_v5  ;;  %v302_v10 = vmul.f32 (!%p256_p9), 0.5, %v301_v6  ;;  %v1405_v60 = vmov (!%p256_p9), 920167782   ;;  %v1406_v3 = vmov (!%p256_p9), 1326507024   ;;  %s1173_s20 = sshll.u32 (!%p256_p9), %s1477_s9, 6 }
  0x14   : > { %846 = vperm.xlu0 (!%p256_p9), %1329, %v836_v15   ;;  %856 = vperm.xlu1 (!%p256_p9), %1330, %v838_v16   ;;  %s283_s21 = scalar_lea.vmem (!%p256_p9), [#allocation2], %s1142_s19  ;;  %s1626_s25 = scalar_lea.hbm (!%p256_p9), %s1676_s8, %s1173_s20 }
  0x15   : > { %v291_v13 = vmul.f32 0.0625, %v289_v9  ;;  %v303_v14 = vfloor.f32 %v302_v10  ;;  %s1092_s22 = sshll.u32 %s283_s21, 4  ;;  %s1079_s26 = scalar_lea.sflag [#allocation3], %s281_s18  ;;  %s1628_s22 = int_to_ptr.vmem [resolvable:$true] %s1092_s22 }
  0x16   : > { %s1335_s10 = scalar_lea.vmem %s1628_s22, 64  ;;  %s1410_s9 = smov [#allocation2]  }
  0x17   : > { %v292_v17 = vfloor.f32 %v291_v13  ;;  %v304_v18 = vmul.f32 2.0, %v303_v14  ;;  %vm308_vm2 = vcmp.ge.f32.partialorder %v303_v14, 1.0  ;;  %vm310_vm3 = vcmp.ge.f32.partialorder %v303_v14, 2.0  ;;  %p1336_p10 = scmp.ne.s32.totalorder %s1628_s22, %s1335_s10  ;;  %s1339_s12 = sshll.u32 %s1410_s9, 4  ;;  %s1340_s12 = int_to_ptr.vmem [resolvable:$false] %s1339_s12 }
  0x18   : > { %v309_v23 = vsel %vm308_vm2, 6.2831855, %v1400_v22  ;;  %vm312_vm4 = vcmp.ge.f32.partialorder %v303_v14, 3.0  ;;  %877 = vperm.xlu0 %1329, %v871_v19   ;;  %882 = vperm.xlu1 %1330, %v872_v25   ;;  %s1341_s13 = scalar_lea.vmem %s1340_s12, 128  ;;  %p1342_p13 = scmp.lt.s32.totalorder %s1628_s22, %s1340_s12 }
  0x19   : > { %v293_v20 = vmul.f32 16.0, %v292_v17  ;;  %v295_v21 = vmul.f32 0.13333334, %v292_v17  ;;  %v305_v24 = vsub.f32 %v301_v6, %v304_v18  ;;  %v311_v27 = vsel %vm310_vm3, 12.566371, %v309_v23  ;;  %p1337_p11 = pnand %p1336_p10, %p1494_p5  ;;  %p1343_p0 = scmp.lt.s32.totalorder %s1341_s13, %s1335_s10 }
  0x1a   : > { %v313_v33 = vsel %vm312_vm4, 25.132742, %v311_v27 }
  0x1b   : > { %v294_v26 = vsub.f32 %v289_v9, %v293_v20  ;;  %v1144_v28 = vadd.f32 -1.0, %v295_v21  ;;  %vm306_vm5 = vcmp.gt.f32.partialorder %v305_v24, 0.5  ;;  %p1338_p12 = pneg %p1337_p11  ;;  %p1344_p1 = por %p1343_p0, %p1342_p13 }
  0x1c   : > { %887 = vperm.xlu0 %1329, %v873_v30   ;;  %892 = vperm.xlu1 %1330, %v874_v31  }
  0x1d   : > { %v297_v29 = vmul.f32 0.13333334, %v294_v26  ;;  %p1345_p2 = pnand %p1344_p1, %p1338_p12 }
  0x1f   : > { %v1145_v32 = vadd.f32 -1.0, %v297_v29 }
  0x20   : > { %1001 = vperm.xlu0 %1329, %v998_v36  }
  0x21   : > { %v307_v34 = vsel %vm306_vm5, %v1145_v32, %v1144_v28 }
  0x22   : > { %v1543_v37 = vmul.f32 %v313_v33, %v307_v34  ;;  %1212 = vmatprep.subr.msk.mxu0 %vm641_vm6, %v307_v34 }
  0x23   : > { %1213 = vmatpush3.msk.msra.mxu0 %vm641_vm6, %v307_v34 }
  0x24   : > { %v318_v39 = vand.u32 2139095040, %v1543_v37  ;;  %1215 = vmatmul.mubr.msk.f32.vlgmr.msra.gmra.mrb[0].mxu0 %vm628_vm0, %v523_v35  ;;  %v315_v43 = vand.u32 2147483647, %v1543_v37  ;;  %vm317_vm14 = vcmp.lt.s32.totalorder %v1543_v37, 0 }
  0x25   : > { %1217 = vmatprep.mubr.msk.f32.mxu0 %vm628_vm0, %v524_v38 }
  0x26   : > { %v319_v41 = vshrl.u32 %v318_v39, 23  ;;  %v322_v46 = vand.u32 8388607, %v315_v43  ;;  %vm316_vm15 = vcmp.le.f32.partialorder %v315_v43, 0.7853982 }
  0x28   : > { %v1146_v44 = vadd.s32 4294967169, %v319_v41  ;;  %1218 = vmatmul.mubr.msk.f32.gmra.mrb[2].mxu0 %vm628_vm0, %v525_v40  ;;  %v323_v50 = vor.u32 8388608, %v322_v46 }
  0x29   : > { %1222 = vmatprep.mubr.msk.f32.mxu0 %vm530_vm1, %v730_v42 }
  0x2a   : > { %v325_v45 = vadd.s32 1, %v1146_v44  ;;  %v363_v5 = vshll.u32 %v323_v50, 8 }
  0x2c   : > { %vm326_vm7 = vcmp.gt.s32.totalorder %v325_v45, 0 }
  0x2d   : > { %v327_v47 = vsel %vm326_vm7, %v325_v45, 0  ;;  %vm407_vm7 = vweird.f32 %v1543_v37 }
  0x2e   : > { %v329_v48 = vand.u32 31, %v327_v47  ;;  %v328_v49 = vshrl.u32 %v327_v47, 5 }
  0x30   : > { %v330_v51 = vsub.s32 32, %v329_v48  ;;  %v332_v53 = vshll.u32 %v1401_v52, %v329_v48  ;;  %v335_v55 = vshll.u32 %v1402_v54, %v329_v48  ;;  %v338_v57 = vshll.u32 %v1403_v56, %v329_v48 }
  0x31   : > { %v341_v59 = vshll.u32 %v1404_v58, %v329_v48  ;;  %v344_v61 = vshll.u32 %v1405_v60, %v329_v48  ;;  %vm347_vm8 = vcmp.lt.s32.totalorder %v328_v49, 1  ;;  %vm350_vm9 = vcmp.lt.s32.totalorder %v328_v49, 4 }
  0x32   : > { %v331_v62 = vshrl.u32 %v1401_v52, %v330_v51  ;;  %v333_v63 = vshrl.u32 %v1402_v54, %v330_v51  ;;  %v336_v0 = vshrl.u32 %v1403_v56, %v330_v51  ;;  %v339_v1 = vshrl.u32 %v1404_v58, %v330_v51 }
  0x33   : > { %v342_v2 = vshrl.u32 %v1405_v60, %v330_v51  ;;  %v345_v4 = vshrl.u32 %v1406_v3, %v330_v51  ;;  %vm348_vm10 = vcmp.lt.s32.totalorder %v328_v49, 2  ;;  %vm349_vm11 = vcmp.lt.s32.totalorder %v328_v49, 3 }
  0x34   : > { %v334_v6 = vor.u32 %v333_v63, %v332_v53  ;;  %v337_v7 = vor.u32 %v336_v0, %v335_v55  ;;  %v340_v8 = vor.u32 %v339_v1, %v338_v57 }
  0x35   : > { %v343_v9 = vor.u32 %v342_v2, %v341_v59  ;;  %v346_v10 = vor.u32 %v345_v4, %v344_v61 }
  0x36   : > { %v351_v11 = vsel %vm347_vm8, %v331_v62, %v334_v6  ;;  %v352_v12 = vsel %vm350_vm9, %v340_v8, 2102212464  ;;  %v355_v13 = vsel %vm347_vm8, %v334_v6, %v337_v7  ;;  %v359_v14 = vsel %vm347_vm8, %v337_v7, %v340_v8 }
  0x37   : > { %v353_v15 = vsel %vm349_vm11, %v337_v7, %v352_v12  ;;  %v356_v16 = vsel %vm350_vm9, %v343_v9, 920167782  ;;  %v360_v17 = vsel %vm350_vm9, %v346_v10, 1326507024  ;;  %v527_v10 = vld [vmem:[%s1669_s1 + $0x8] sm:$0xff]  ;;  %v732_v12 = vld [vmem:[%s1670_s2 + $0x10] sm:$0xff] }
  0x38   : > { %v357_v18 = vsel %vm349_vm11, %v340_v8, %v356_v16  ;;  %v361_v19 = vsel %vm349_vm11, %v343_v9, %v360_v17  ;;  %v354_v20 = vsel %vm348_vm10, %v351_v11, %v353_v15  ;;  %v731_v11 = vld [vmem:[%s1670_s2 + $0x8] sm:$0xff]  ;;  %v867_v15 = vld [vmem:[%s1672_s4] sm:$0xff]  ;;  %vm895_vm8 = vcmask 261120  }
  0x39   : > { %v358_v21 = vsel %vm348_vm10, %v355_v13, %v357_v18  ;;  %v362_v22 = vsel %vm348_vm10, %v359_v14, %v361_v19  ;;  %v370_v27 = vmul.u32 %v363_v5, %v354_v20  ;;  %v529_v13 = vld [vmem:[%s1669_s1 + $0x18] sm:$0xff] }
  0x3a   : > { %v1562_v23 = vmul.u32.u64.low %v363_v5, %v362_v22  ;;  %v1563_v24 = vmul.u32.u64.high %v363_v5, %v362_v22, %v1562_v23  ;;  %v1565_v25 = vmul.u32.u64.low %v363_v5, %v358_v21  ;;  %v1566_v26 = vmul.u32.u64.high %v363_v5, %v358_v21, %v1565_v25  ;;  %v733_v14 = vld [vmem:[%s1670_s2 + $0x18] sm:$0xff] }
  0x3c   : > { %vm372_vm12 = vc.u32 %v1563_v24, %v1565_v25  ;;  %v373_v28 = vadd.s32 1, %v1566_v26  ;;  %v371_v40 = vadd.s32 %v1565_v25, %v1563_v24 }
  0x3e   : > { %v374_v29 = vsel %vm372_vm12, %v373_v28, %v1566_v26 }
  0x3f   : > { %v375_v30 = vadd.s32 %v374_v29, %v370_v27 }
  0x41   : > { %v376_v31 = vadd.s32 536870912, %v375_v30 }
  0x43   : > { %v377_v32 = vshrl.u32 %v376_v31, 30 }
  0x45   : > { %v378_v33 = vshll.u32 %v377_v32, 30  ;;  %v401_v53 = vsub.s32 4, %v377_v32 }
  0x47   : > { %v379_v34 = vsub.s32 %v375_v30, %v378_v33  ;;  %v402_v56 = vsel %vm317_vm14, %v401_v53, %v377_v32 }
  0x48   : > { %v404_v59 = vsel %vm316_vm15, 0, %v402_v56 }
  0x49   : > { %v381_v35 = vsub.s32 0, %v379_v34  ;;  %v408_v60 = vadd.s32 3, %v404_v59  ;;  %v512_v62 = vand.u32 3, %v404_v59 }
  0x4b   : > { %v1147_v36 = vmin.u32 %v381_v35, %v379_v34  ;;  %v409_v61 = vand.u32 3, %v408_v60  ;;  %vm517_vm2 = vcmp.eq.s32.totalorder %v512_v62, 2  ;;  %vm514_vm4 = vcmp.eq.s32.totalorder %v512_v62, 0 }
  0x4c   : > { %vm513_vm6 = vcmp.lt.s32.totalorder %v512_v62, 2 }
  0x4d   : > { %v383_v38 = vclz %v1147_v36  ;;  %vm414_vm0 = vcmp.eq.s32.totalorder %v409_v61, 2  ;;  %vm411_vm3 = vcmp.eq.s32.totalorder %v409_v61, 0  ;;  %vm410_vm5 = vcmp.lt.s32.totalorder %v409_v61, 2 }
  0x4f   : > { %v1148_v39 = vadd.s32 4294967294, %v383_v38 }
  0x51   : > { %vm1149_vm13 = vcmp.lt.s32.totalorder %v1148_v39, 0 }
  0x52   : > { %v386_v41 = vsel %vm1149_vm13, 0, %v1148_v39 }
  0x53   : > { %v387_v42 = vsub.s32 32, %v386_v41  ;;  %v388_v44 = vshll.u32 %v379_v34, %v386_v41  ;;  %v391_v45 = vsub.s32 4294967266, %v386_v41 }
  0x55   : > { %v389_v46 = vshrl.u32 %v371_v40, %v387_v42  ;;  %v392_v47 = vadd.s32 127, %v391_v45  ;;  %v869_v45 = vld [vmem:[%s1672_s4 + $0x10] sm:$0xff] }
  0x57   : > { %v390_v48 = vor.u32 %v389_v46, %v388_v44  ;;  %v393_v49 = vshll.u32 %v392_v47, 23  ;;  %v868_v44 = vld [vmem:[%s1672_s4 + $0x8] sm:$0xff]  ;;  %v870_v46 = vld [vmem:[%s1672_s4 + $0x18] sm:$0xff]  ;;  %v1407_v47 = vmov 0.0|0.0  }
  0x59   : > { %v394_v50 = vor.u32 4788187, %v393_v49  ;;  %v397_v51 = vcvt.s32.f32 %v390_v48  ;;  %v1409_v48 = vmov 0.0  }
  0x5b   : > { %v395_v52 = vand.u32 2147483647, %v394_v50 }
  0x5d   : > { %v398_v54 = vmul.f32 %v397_v51, %v395_v52 }
  0x5f   : > { %v399_v55 = vxor.u32 2147483648, %v398_v54 }
  0x61   : > { %v400_v57 = vsel %vm317_vm14, %v399_v55, %v398_v54 }
  0x62   : > { %v403_v58 = vsel %vm316_vm15, %v1543_v37, %v400_v57  ;;  %v528_v37 = vld [vmem:[%s1669_s1 + $0x10] sm:$0xff] }
  0x63   : > { %1331 = vcosq.f32 %v403_v58 }
  0x64   : > { %1333 = vsinq.f32 %v403_v58 }
  0x6d   : > { %v1332_v63 = vpop.eup %1331 }
  0x6e   : > { %v1334_v0 = vpop.eup %1333  ;;  %v415_v1 = vxor.u32 2147483648, %v1332_v63 }
  0x6f   : > { %v412_v43 = vxor.u32 2147483648, %v1334_v0 }
  0x70   : > { %v416_v2 = vsel %vm414_vm0, %v415_v1, %v1334_v0  ;;  %v519_v3 = vsel %vm517_vm2, %v415_v1, %v1334_v0 }
  0x71   : > { %v413_v4 = vsel %vm411_vm3, %v1332_v63, %v412_v43  ;;  %v516_v5 = vsel %vm514_vm4, %v1332_v63, %v412_v43 }
  0x72   : > { %v417_v6 = vsel %vm410_vm5, %v413_v4, %v416_v2  ;;  %v520_v7 = vsel %vm513_vm6, %v516_v5, %v519_v3  ;;  %v997_v2 = vld [vmem:[%s1674_s6] sm:$0x7] }
  0x73   : > { %v418_v8 = vsel %vm407_vm7, nan, %v417_v6  ;;  %v521_v9 = vsel %vm407_vm7, nan, %v520_v7 }
  0x74   : > { %1204 = vmatprep.subr.mxu1 %v418_v8  ;;  %1220 = vmatprep.subr.mxu0 %v521_v9 }
  0x75   : > { %1205 = vmatpush3.msra.mxu1 %v418_v8  ;;  %1221 = vmatpush3.msra.mxu0 %v521_v9 }
  0x76   : > { %1207 = vmatmul.mubr.msk.f32.vlgmr.msra.gmra.mrb[0].mxu1 %vm530_vm1, %v527_v10  ;;  %1223 = vmatmul.mubr.msk.f32.vlgmr.msra.gmra.mrb[0].mxu0 %vm530_vm1, %v731_v11 }
  0x77   : > { %1209 = vmatprep.mubr.msk.f32.mxu1 %vm530_vm1, %v528_v37  ;;  %1225 = vmatprep.mubr.msk.f32.mxu0 %vm530_vm1, %v732_v12 }
  0x7a   : > { %1210 = vmatmul.mubr.msk.f32.gmra.mrb[2].mxu1 %vm530_vm1, %v529_v13  ;;  %1226 = vmatmul.mubr.msk.f32.gmra.mrb[2].mxu0 %vm530_vm1, %v733_v14  ;;  %vm1408_vm1 = vmmov 0  }
  0x7b   : > { %1236 = vmatprep.mubr.msk.f32.mxu1 %vm895_vm8, %v867_v15 }
  0x8f   : > { %v842_v16 = vpop.permute.xlu0 %841  ;;  %v852_v17 = vpop.permute.xlu1 %851 }
  0x93   : > { %v847_v23 = vpop.permute.xlu0 %846  ;;  %v857_v33 = vpop.permute.xlu1 %856 }
  0x97   : > { %v883_v49 = vpop.permute.xlu1 %882  ;;  %v878_v50 = vpop.permute.xlu0 %877 }
  0x9b   : > { %v893_v56 = vpop.permute.xlu1 %892  ;;  %v888_v59 = vpop.permute.xlu0 %887 }
  0x9f   : > { %v1002_v3 = vpop.permute.xlu0 %1001 }
 0x149   : > { %v1208_v18 = vpop.f32.mrb[0].mxu1  ;;  %v1224_v19 = vpop.f32.mrb[0].mxu0 }
 0x14a   : > { %v1267_v20 = vadd.f32 %v1224_v19, %v1208_v18  ;;  %v609_v21 = vpop.f32.mrb[1].mxu1  ;;  %v812_v22 = vpop.f32.mrb[1].mxu0 }
 0x14b   : > { %v1268_v24 = vadd.f32 %v812_v22, %v609_v21 }
 0x14c   : > { %v860_v25 = vadd.f32 %v1267_v20, %v847_v23 }
 0x14d   : > { %v859_v26 = vadd.f32 %v1268_v24, %v842_v16  ;;  %v1211_v27 = vpop.f32.mrb[2].mxu1  ;;  %v1227_v28 = vpop.f32.mrb[2].mxu0 }
 0x14e   : > { %v864_v29 = vmax.f32 %v860_v25, 0.0  ;;  %v1269_v30 = vadd.f32 %v1227_v28, %v1211_v27  ;;  %v619_v31 = vpop.f32.mrb[3].mxu1  ;;  %v822_v32 = vpop.f32.mrb[3].mxu0 }
 0x14f   : > { %v863_v34 = vmax.f32 %v859_v26, 0.0  ;;  %v1270_v35 = vadd.f32 %v822_v32, %v619_v31 }
 0x150   : > { %v862_v36 = vadd.f32 %v1269_v30, %v857_v33 }
 0x151   : > { %v861_v38 = vadd.f32 %v1270_v35, %v852_v17  ;;  %v1253_v39 = vpack.c.bf16 %v864_v29, %v863_v34 }
 0x152   : > { %v866_v40 = vmax.f32 %v862_v36, 0.0 }
 0x153   : > { %v865_v41 = vmax.f32 %v861_v38, 0.0  ;;  %1254 = vmatprep.subr.bf16.mxu1 %v1253_v39 }
 0x154   : > { %1256 = vmatpush3.bf16.msra.mxu1 %v1253_v39 }
 0x155   : > { %v1257_v42 = vpack.c.bf16 %v866_v40, %v865_v41 }
 0x157   : > { %1258 = vmatprep.subr.bf16.mxu1 %v1257_v42 }
 0x158   : > { %1260 = vmatpush3.bf16.msra.mxu1 %v1257_v42 }
 0x159   : > { %1261 = vmatprep.subr.bf16.mxu1 %v1407_v47 }
 0x15b   : > { %1237 = vmatmul.mubr.msk.f32.vlgmr.msra.gmra.mrb[4].mxu1 %vm895_vm8, %v868_v44 }
 0x15c   : > { %1239 = vmatprep.mubr.msk.f32.mxu1 %vm895_vm8, %v869_v45 }
 0x15f   : > { %1240 = vmatmul.mubr.msk.f32.gmra.mrb[6].mxu1 %vm895_vm8, %v870_v46 }
 0x160   : > { %1250 = vmatprep.mubr.msk.f32.mxu1 %vm1408_vm1, %v1409_v48 }
 0x22e   : > { %v1238_v51 = vpop.f32.mrb[4].mxu1 }
 0x22f   : > { %v980_v52 = vadd.f32 %v1238_v51, %v883_v49  ;;  %v974_v53 = vpop.f32.mrb[5].mxu1 }
 0x230   : > { %v975_v54 = vadd.f32 %v974_v53, %v878_v50 }
 0x231   : > { %v994_v55 = vmax.f32 %v980_v52, 0.0 }
 0x232   : > { %v993_v57 = vmax.f32 %v975_v54, 0.0  ;;  %v1241_v58 = vpop.f32.mrb[6].mxu1 }
 0x233   : > { %v990_v60 = vadd.f32 %v1241_v58, %v893_v56  ;;  %v984_v61 = vpop.f32.mrb[7].mxu1 }
 0x234   : > { %v1262_v62 = vpack.c.bf16 %v994_v55, %v993_v57  ;;  %v985_v63 = vadd.f32 %v984_v61, %v888_v59 }
 0x235   : > { %v996_v0 = vmax.f32 %v990_v60, 0.0 }
 0x236   : > { %v995_v1 = vmax.f32 %v985_v63, 0.0  ;;  %1263 = vmatpush3.bf16.msra.mxu1 %v1262_v62 }
 0x237   : > { %1264 = vmatprep.subr.bf16.mxu1 %v1407_v47 }
 0x238   : > { %v1265_v43 = vpack.c.bf16 %v996_v0, %v995_v1 }
 0x23a   : > { %1266 = vmatpush3.bf16.msra.mxu1 %v1265_v43 }
 0x23d   : > { %1251 = vmatmul.mubr.msk.f32.vlgmr.msra.gmra.mrb[8].mxu1 %vm895_vm8, %v997_v2 }
 0x310   : > { %v1073_v4 = vpop.f32.mrb[8].mxu1 }
 0x311   : > { %v1074_v5 = vadd.f32 %v1073_v4, %v1002_v3  ;;  %v1252_v6 = vpop.f32.mrb[9].mxu1 }
 0x313   : > { %1077 = vst [vmem:[%s283_s21] sm:$0x7] %v1074_v5 }
 0x314   : > { %1348 = shalt.err (!%p1345_p2)
}
 0x315   : > { %s1349_s17 = scalar_lea.hbm %s1626_s25, 64  ;;  %s1353_s20 = scalar_lea.hbm %s1676_s8, 128 }
 0x316   : > { %p1350_p3 = scmp.ne.s32.totalorder %s1626_s25, %s1349_s17  ;;  %p1354_p8 = scmp.lt.u32.totalorder %s1626_s25, %s1676_s8 }
 0x317   : > { %p1355_p9 = scmp.lt.u32.totalorder %s1353_s20, %s1349_s17  ;;  %p1357_p11 = scmp.lt.u32.totalorder %s1349_s17, %s1626_s25 }
 0x318   : > { %p1351_p4 = pnand %p1350_p3, %p1494_p5 }
 0x319   : > { %p1356_p10 = por %p1355_p9, %p1354_p8 }
 0x31a   : > { %p1352_p7 = pneg %p1351_p4 }
 0x31b   : > { %p1358_p12 = por %p1357_p11, %p1356_p10 }
 0x31d   : > { %p1359_p13 = pnand %p1358_p12, %p1352_p7 }
 0x31f   : > { %1362 = shalt.err (!%p1359_p13)
}
 0x320   : > { %1279 = dma.vmem_to_hbm [thread:$0]  (%p1494_p5), %s1628_s22, 64, %s1626_s25, %s1079_s26  }
 0x321 PF: > { %p1285_p0 = scmp.ge.s32.totalorder %s1397_s30, 2  ;;  %s1104_s24 = sand.u32 1, %s1385_s27  }
 0x322   : > { %s1105_s10 = scalar_lea.sflag [#allocation3], %s1104_s24 }
 0x323   : > { %p1282_p1 = pnand %p1285_p0, %p1498_p6 }
 0x325   : > { %1380 = dma.done.wait (!%p1282_p1), %s1105_s10, 64  }
 0x326   : > { %1382 = vsyncadd (!%p1282_p1), %s1105_s10, 4294967232  ;;  %p18_p2 = scmp.ge.s32.totalorder %s1481_s11, 4   ;;  %s1679_s27 = smov %s1389_s28 }
 0x327   : > { %s1680_s28 = smov %s1393_s29  ;;  %s1681_s29 = smov %s1492_s14 }
 0x328   : > { %s1682_s30 = smov %s1481_s11  ;;  %20 = sbr.rel (!%p18_p2) target bundleno = 3 (0x3), region = 84 }
 0x32f   :  { %1110 = vsyncpa [#allocation3], 1 }
 0x330   :  { %1112 = vsyncpa [#allocation3 + $0x1], 1 }

</bundles_post_ra>
